<compile_context>
chip_gen: v7x
topology: tpu7x:2x2x1
jax: 0.10.0
libtpu: 0.0.40
codegen_flags: <defaults>
</compile_context>

<pallas_src>
import functools

import jax
import jax.numpy as jnp
from jax import lax
from jax.experimental import pallas as pl
from jax.experimental.pallas import tpu as pltpu


_LANES = 128
_NEG = -1e30
# Lane offsets of the per-row-block accumulator planes inside the (tm, 512) output block.
_MX, _DN, _WS, _NS = 0, 128, 256, 384
_OUT_W = 512


def _round_up(x: int, m: int) -> int:
    return ((x + m - 1) // m) * m


def _pick_tile(m_pad: int, cap: int) -> int:
    """Largest multiple of 128 that divides m_pad and is <= cap (m_pad is a multiple of 128)."""
    best = _LANES
    d = _LANES
    top = min(cap, m_pad)
    while d <= top:
        if m_pad % d == 0:
            best = d
        d += _LANES
    return best


def _semi_sup_contrast_kernel(
    z_row_ref, z_col_ref,   # bf16 (tm, C+P) / (tk, C+P): [features | normalized phenotypes]
    out_ref,                # f32 (tm, 512): per-lane [running max | denom | sum(wm) | sum(wm*adc)]
    *, inv_temp: float, m_valid: int, has_pad: bool, tm: int, tk: int, c_pad: int,
):
    i = pl.program_id(0)            # row block    ("parallel")
    j = pl.program_id(1)            # column block ("arbitrary", reduction axis)
    nc = pl.num_programs(1)

    @pl.when(j == 0)
    def _init():
        out_ref[:, _MX:_MX + _LANES] = jnp.full((tm, _LANES), _NEG, jnp.float32)
        out_ref[:, _DN:_DN + _LANES] = jnp.zeros((tm, _LANES), jnp.float32)
        out_ref[:, _WS:_WS + _LANES] = jnp.zeros((tm, _LANES), jnp.float32)
        out_ref[:, _NS:_NS + _LANES] = jnp.zeros((tm, _LANES), jnp.float32)

    # A @ B^T by contracting the last dims of both operands (no XLU transpose), f32 accumulate.
    dn = (((1,), (1,)), ((), ()))
    adc = lax.dot_general(z_row_ref[:, :c_pad], z_col_ref[:, :c_pad], dn,
                          preferred_element_type=jnp.float32) * inv_temp      # (tm, tk)
    adj = lax.dot_general(z_row_ref[:, c_pad:], z_col_ref[:, c_pad:], dn,
                          preferred_element_type=jnp.float32)                 # (tm, tk)

    nchunks = tk // _LANES

    def accumulate(valid):
        # Fold tk -> 128 lanes using lane-aligned VPU ops only; the single cross-lane combine
        # happens in the O(M) wrapper epilogue.
        m_prev = out_ref[:, _MX:_MX + _LANES]

        # Per-lane block max.
        if valid is None:
            blk_max = adc[:, 0:_LANES]
            for c in range(1, nchunks):
                blk_max = jnp.maximum(blk_max, adc[:, c * _LANES:(c + 1) * _LANES])
        else:
            blk_max = jnp.where(valid[:, 0:_LANES], adc[:, 0:_LANES], _NEG)
            for c in range(1, nchunks):
                sl = slice(c * _LANES, (c + 1) * _LANES)
                blk_max = jnp.maximum(blk_max, jnp.where(valid[:, sl], adc[:, sl], _NEG))
        m_new = jnp.maximum(m_prev, blk_max)

        # Per-lane online softmax denominator + soft-positive weight sums.
        d_new = out_ref[:, _DN:_DN + _LANES] * jnp.exp(m_prev - m_new)
        w_new = out_ref[:, _WS:_WS + _LANES]
        n_new = out_ref[:, _NS:_NS + _LANES]
        for c in range(nchunks):
            sl = slice(c * _LANES, (c + 1) * _LANES)
            a = adc[:, sl]
            wm = jnp.maximum(adj[:, sl], 0.0)          # relu(adj): adj * (adj > 0)
            if valid is None:
                d_new = d_new + jnp.exp(a - m_new)
            else:
                vm = valid[:, sl]
                d_new = d_new + jnp.where(vm, jnp.exp(a - m_new), 0.0)
                wm = jnp.where(vm, wm, 0.0)
            w_new = w_new + wm
            n_new = n_new + wm * a

        out_ref[:, _MX:_MX + _LANES] = m_new
        out_ref[:, _DN:_DN + _LANES] = d_new
        out_ref[:, _WS:_WS + _LANES] = w_new
        out_ref[:, _NS:_NS + _LANES] = n_new

    # Diagonal (self-pair) columns only live in column blocks overlapping this row block, and
    # zero-padded columns only live in the last column block; everything else takes the
    # unmasked fast path (no iotas / compares / selects in the hot loop).
    is_diag = jnp.logical_and(j * tk < (i + 1) * tm, (j + 1) * tk > i * tm)
    needs_mask = jnp.logical_or(is_diag, j == nc - 1) if has_pad else is_diag

    @pl.when(needs_mask)
    def _masked():
        row_ids = i * tm + lax.broadcasted_iota(jnp.int32, (tm, tk), 0)
        col_ids = j * tk + lax.broadcasted_iota(jnp.int32, (tm, tk), 1)
        accumulate(jnp.logical_and(col_ids < m_valid, col_ids != row_ids))

    @pl.when(jnp.logical_not(needs_mask))
    def _fast():
        accumulate(None)


def semi_supervised_contrast(
    features, phenotypes, *, temperature=0.07, alpha=0.5,
    block_m=512, block_k=256, matmul_dtype=jnp.bfloat16,
):
    """features: (B, V, C); phenotypes: (B*V, P). Returns scalar float32 loss."""
    B, V, C = features.shape
    M = B * V
    assert phenotypes.shape[0] == M, "phenotypes must have B*V rows"
    P = phenotypes.shape[1]
    inv_temp = float(1.0 / temperature)

    f = jnp.reshape(features, (M, C)).astype(jnp.float32)
    p = phenotypes.astype(jnp.float32)
    # Cosine-similarity adjacency == Gram matrix of rows normalized with eps=1e-8 norm clamp.
    pn = p / jnp.maximum(jnp.linalg.norm(p, axis=-1, keepdims=True), 1e-8)

    # ---- pad to TPU-friendly, lane-dense shapes ----
    C_pad = _round_up(max(C, 1), _LANES)
    P_pad = _round_up(max(P, 1), _LANES)
    M_pad = _round_up(M, _LANES)

    tm = _pick_tile(M_pad, block_m)
    tk = _pick_tile(M_pad, block_k)
    # Keep >= 2 row blocks when possible so both v7x TensorCores get work on the parallel axis.
    if tm == M_pad and M_pad >= 2 * _LANES and (M_pad // 2) % _LANES == 0:
        tm = M_pad // 2

    f_pad = jnp.zeros((M_pad, C_pad), matmul_dtype).at[:M, :C].set(f.astype(matmul_dtype))
    p_pad = jnp.zeros((M_pad, P_pad), matmul_dtype).at[:M, :P].set(pn.astype(matmul_dtype))
    z_pad = jnp.concatenate([f_pad, p_pad], axis=1)       # (M_pad, C_pad + P_pad)

    nr, ncb = M_pad // tm, M_pad // tk
    kernel = functools.partial(
        _semi_sup_contrast_kernel,
        inv_temp=inv_temp, m_valid=M, has_pad=(M_pad != M), tm=tm, tk=tk, c_pad=C_pad,
    )

    stats = pl.pallas_call(
        kernel,
        out_shape=jax.ShapeDtypeStruct((M_pad, _OUT_W), jnp.float32),
        grid_spec=pltpu.PrefetchScalarGridSpec(
            num_scalar_prefetch=0,
            grid=(nr, ncb),
            in_specs=[
                pl.BlockSpec((tm, C_pad + P_pad), lambda i, j: (i, 0)),   # row block
                pl.BlockSpec((tk, C_pad + P_pad), lambda i, j: (j, 0)),   # column block (stream)
            ],
            # Constant block index along j => resident VMEM accumulator, written back per row block.
            out_specs=pl.BlockSpec((tm, _OUT_W), lambda i, j: (i, 0)),
        ),
        compiler_params=pltpu.CompilerParams(
            dimension_semantics=("parallel", "arbitrary"),
            vmem_limit_bytes=48 * 1024 * 1024,
        ),
        cost_estimate=pl.CostEstimate(
            flops=2 * M_pad * M_pad * (C_pad + P_pad),
            transcendentals=M_pad * M_pad + nr * M_pad * _LANES,
            # Column stream is re-read once per row block.
            bytes_accessed=(nr + 1) * M_pad * (C_pad + P_pad) * 2 + M_pad * _OUT_W * 4,
        ),
    )(z_pad, z_pad)

    # ---- O(M) epilogue (negligible vs the O(M^2 (C+P)) kernel work) ----
    m_lane = stats[:M, _MX:_MX + _LANES]
    d_lane = stats[:M, _DN:_DN + _LANES]
    w_lane = stats[:M, _WS:_WS + _LANES]
    n_lane = stats[:M, _NS:_NS + _LANES]

    m_row = jnp.max(m_lane, axis=1, keepdims=True)
    d_row = jnp.sum(d_lane * jnp.exp(m_lane - m_row), axis=1)
    lse = m_row[:, 0] + jnp.log(d_row)          # log sum_{j != i} exp(adc_ij)
    w_row = jnp.sum(w_lane, axis=1)             # sum_j relu(adj_ij), diagonal excluded
    n_row = jnp.sum(n_lane, axis=1)             # sum_j relu(adj_ij) * adc_ij, diagonal excluded

    # sum_j adc_ij (diagonal included) via the exact matvec identity f_i . (sum_j f_j),
    # computed in pure f32 from the same bf16-quantized operand the MXU saw.
    f32 = f_pad.astype(jnp.float32)
    colsum = jnp.sum(f32, axis=0)                                  # padded rows are zero
    s_row = jnp.sum(f32[:M] * colsum[None, :], axis=1) * inv_temp  # (M,)

    # unsupervised: -mean_ij(log_prob_ij) with log_prob_ij = adc_ij - lse_i (diagonal included).
    unsup = -(jnp.sum(s_row) - M * jnp.sum(lse)) / (M * M)
    # supervised: mean_i [ sum_j wm_ij (adc_ij - lse_i) / max(sum_j wm_ij, guard) ] * (-T)
    denom = jnp.where(w_row < 1e-6, 1.0, w_row)
    mlpp = (n_row - lse * w_row) / denom
    sup = -temperature * jnp.mean(mlpp)
    return alpha * sup + (1.0 - alpha) * unsup


def _reference(features, phenotypes, temperature=0.07, alpha=0.5, matmul_dtype=jnp.float32):
    """Torch-faithful dense reference. matmul_dtype=bf16 mirrors the kernel's MXU precision."""
    B, V, C = features.shape
    M = B * V
    f = jnp.reshape(features, (M, C)).astype(jnp.float32)
    p = phenotypes.astype(jnp.float32)
    pn = p / jnp.maximum(jnp.linalg.norm(p, axis=-1, keepdims=True), 1e-8)
    fb = f.astype(matmul_dtype).astype(jnp.float32)
    pnb = pn.astype(matmul_dtype).astype(jnp.float32)

    adj = pnb @ pnb.T
    adc = (fb @ fb.T) / temperature
    logits = adc - jnp.max(adc, axis=1, keepdims=True)
    logits_mask = 1.0 - jnp.eye(M, dtype=jnp.float32)
    exp_logits = jnp.exp(logits) * logits_mask
    log_prob = logits - jnp.log(jnp.sum(exp_logits, axis=1, keepdims=True))
    unsup = -jnp.mean(log_prob)
    wm = jnp.maximum(adj, 0.0) * logits_mask
    mpp = jnp.sum(wm, axis=1)
    mpp = jnp.where(mpp < 1e-6, 1.0, mpp)
    mlpp = jnp.sum(wm * log_prob, axis=1) / mpp
    sup = -(temperature / 1.0) * jnp.mean(mlpp)
    return alpha * sup + (1.0 - alpha) * unsup


if __name__ == "__main__":
    # Small shapes consistent with the module: batch=4, n_views=2, C=32, phenotype dim=16.
    batch_size, n_views, C, P = 4, 2, 32, 16
    M = batch_size * n_views

    key = jax.random.PRNGKey(0)
    kf, kp = jax.random.split(key)
    features = jax.random.normal(kf, (batch_size, n_views, C), dtype=jnp.float32)
    # Contrastive features are L2-normalized by the encoder; unnormalized Gaussians make the
    # original formulation's softmax denominator underflow to 0 (NaN in torch and reference alike).
    features = features / jnp.linalg.norm(features, axis=-1, keepdims=True)
    phenotypes = jax.random.normal(kp, (M, P), dtype=jnp.float32)

    loss = semi_supervised_contrast(features, phenotypes, temperature=0.07, alpha=0.5)
    loss = jax.block_until_ready(loss)

    ref_mirror = _reference(features, phenotypes, 0.07, 0.5, matmul_dtype=jnp.bfloat16)
    ref_f32 = _reference(features, phenotypes, 0.07, 0.5, matmul_dtype=jnp.float32)

    assert bool(jnp.isfinite(loss)), loss
    assert jnp.allclose(loss, ref_mirror, atol=2e-3, rtol=2e-3), (loss, ref_mirror)
    assert jnp.allclose(loss, ref_f32, atol=5e-2, rtol=5e-2), (loss, ref_f32)

    print("KERNEL_OK")
</pallas_src>

<mosaic_0001>
module attributes {stable_mosaic.version = 11 : i64} {
  func.func @_semi_sup_contrast_kernel(%arg0: i32, %arg1: i32, %arg2: memref<128x256xbf16, #tpu.memory_space<vmem>>, %arg3: memref<128x256xbf16, #tpu.memory_space<vmem>>, %arg4: memref<128x512xf32, #tpu.memory_space<vmem>>) attributes {dimension_semantics = [#tpu.dimension_semantics<parallel>, #tpu.dimension_semantics<arbitrary>], iteration_bounds = array<i64: 1, 1>, scalar_prefetch = 0 : i64, scratch_operands = 0 : i64, tpu.core_type = #tpu.core_type<tc>, window_params = [{transform_indices = @transform_0, window_bounds = array<i64: 128, 256>}, {transform_indices = @transform_1, window_bounds = array<i64: 128, 256>}, {transform_indices = @transform_2, window_bounds = array<i64: 128, 512>}]} {
    %c0_i32 = arith.constant 0 : i32
    %0 = arith.cmpi eq, %arg1, %c0_i32 : i32
    %1 = arith.extui %0 : i1 to i32
    %c0_i32_0 = arith.constant 0 : i32
    %2 = arith.cmpi ne, %1, %c0_i32_0 : i32
    scf.if %2 {
      %cst_16 = arith.constant -1.000000e+30 : f32
      %27 = vector.broadcast %cst_16 : f32 to vector<128x128xf32>
      %c0_17 = arith.constant 0 : index
      %c0_18 = arith.constant 0 : index
      %28 = vector.load %arg4[%c0_17, %c0_18] : memref<128x512xf32, #tpu.memory_space<vmem>>, vector<128x128xf32>
      tpu.vector_store %arg4[%c0_17, %c0_18], %27 {strides = array<i32>} : memref<128x512xf32, #tpu.memory_space<vmem>>, vector<128x128xf32>,
      %cst_19 = arith.constant 0.000000e+00 : f32
      %29 = vector.broadcast %cst_19 : f32 to vector<128x128xf32>
      %c0_20 = arith.constant 0 : index
      %c128_21 = arith.constant 128 : index
      %30 = vector.load %arg4[%c0_20, %c128_21] : memref<128x512xf32, #tpu.memory_space<vmem>>, vector<128x128xf32>
      tpu.vector_store %arg4[%c0_20, %c128_21], %29 {strides = array<i32>} : memref<128x512xf32, #tpu.memory_space<vmem>>, vector<128x128xf32>,
      %cst_22 = arith.constant 0.000000e+00 : f32
      %31 = vector.broadcast %cst_22 : f32 to vector<128x128xf32>
      %c0_23 = arith.constant 0 : index
      %c256 = arith.constant 256 : index
      %32 = vector.load %arg4[%c0_23, %c256] : memref<128x512xf32, #tpu.memory_space<vmem>>, vector<128x128xf32>
      tpu.vector_store %arg4[%c0_23, %c256], %31 {strides = array<i32>} : memref<128x512xf32, #tpu.memory_space<vmem>>, vector<128x128xf32>,
      %cst_24 = arith.constant 0.000000e+00 : f32
      %33 = vector.broadcast %cst_24 : f32 to vector<128x128xf32>
      %c0_25 = arith.constant 0 : index
      %c384 = arith.constant 384 : index
      %34 = vector.load %arg4[%c0_25, %c384] : memref<128x512xf32, #tpu.memory_space<vmem>>, vector<128x128xf32>
      tpu.vector_store %arg4[%c0_25, %c384], %33 {strides = array<i32>} : memref<128x512xf32, #tpu.memory_space<vmem>>, vector<128x128xf32>,
    } else {
    }
    %c0 = arith.constant 0 : index
    %c0_1 = arith.constant 0 : index
    %3 = vector.load %arg2[%c0, %c0_1] : memref<128x256xbf16, #tpu.memory_space<vmem>>, vector<128x128xbf16>
    %c0_2 = arith.constant 0 : index
    %c0_3 = arith.constant 0 : index
    %4 = vector.load %arg3[%c0_2, %c0_3] : memref<128x256xbf16, #tpu.memory_space<vmem>>, vector<128x128xbf16>
    %cst = arith.constant dense<0.000000e+00> : vector<128x128xf32>
    %5 = tpu.matmul %3, %4, %cst {dimension_numbers = #tpu.dot_dimension_numbers<[1], [1], [0], [0], [0, 0, 1, 0], [], []>} : vector<128x128xbf16>, vector<128x128xbf16>, vector<128x128xf32> -> vector<128x128xf32>
    %cst_4 = arith.constant 14.2857141 : f32
    %6 = vector.broadcast %cst_4 : f32 to vector<128x128xf32>
    %7 = arith.mulf %5, %6 : vector<128x128xf32>
    %c0_5 = arith.constant 0 : index
    %c128 = arith.constant 128 : index
    %8 = vector.load %arg2[%c0_5, %c128] : memref<128x256xbf16, #tpu.memory_space<vmem>>, vector<128x128xbf16>
    %c0_6 = arith.constant 0 : index
    %c128_7 = arith.constant 128 : index
    %9 = vector.load %arg3[%c0_6, %c128_7] : memref<128x256xbf16, #tpu.memory_space<vmem>>, vector<128x128xbf16>
    %cst_8 = arith.constant dense<0.000000e+00> : vector<128x128xf32>
    %10 = tpu.matmul %8, %9, %cst_8 {dimension_numbers = #tpu.dot_dimension_numbers<[1], [1], [0], [0], [0, 0, 1, 0], [], []>} : vector<128x128xbf16>, vector<128x128xbf16>, vector<128x128xf32> -> vector<128x128xf32>
    %c128_i32 = arith.constant 128 : i32
    %11 = arith.muli %arg1, %c128_i32 : i32
    %c1_i32 = arith.constant 1 : i32
    %12 = arith.addi %arg0, %c1_i32 : i32
    %c128_i32_9 = arith.constant 128 : i32
    %13 = arith.muli %12, %c128_i32_9 : i32
    %14 = arith.cmpi slt, %11, %13 : i32
    %c1_i32_10 = arith.constant 1 : i32
    %15 = arith.addi %arg1, %c1_i32_10 : i32
    %c128_i32_11 = arith.constant 128 : i32
    %16 = arith.muli %15, %c128_i32_11 : i32
    %c128_i32_12 = arith.constant 128 : i32
    %17 = arith.muli %arg0, %c128_i32_12 : i32
    %18 = arith.cmpi sgt, %16, %17 : i32
    %19 = arith.andi %14, %18 : i1
    %c0_i32_13 = arith.constant 0 : i32
    %20 = arith.cmpi eq, %arg1, %c0_i32_13 : i32
    %21 = arith.ori %19, %20 : i1
    %22 = arith.extui %21 : i1 to i32
    %c0_i32_14 = arith.constant 0 : i32
    %23 = arith.cmpi ne, %22, %c0_i32_14 : i32
    scf.if %23 {
      %c128_i32_16 = arith.constant 128 : i32
      %27 = arith.muli %arg0, %c128_i32_16 : i32
      %28 = tpu.iota {dimensions = array<i32: 0>} : vector<128x128xi32>
      %29 = vector.broadcast %27 : i32 to vector<128x128xi32>
      %30 = arith.addi %29, %28 : vector<128x128xi32>
      %c128_i32_17 = arith.constant 128 : i32
      %31 = arith.muli %arg1, %c128_i32_17 : i32
      %32 = tpu.iota {dimensions = array<i32: 1>} : vector<128x128xi32>
      %33 = vector.broadcast %31 : i32 to vector<128x128xi32>
      %34 = arith.addi %33, %32 : vector<128x128xi32>
      %c8_i32 = arith.constant 8 : i32
      %35 = vector.broadcast %c8_i32 : i32 to vector<128x128xi32>
      %36 = arith.cmpi slt, %34, %35 : vector<128x128xi32>
      %37 = arith.cmpi ne, %34, %30 : vector<128x128xi32>
      %38 = arith.andi %36, %37 : vector<128x128xi1>
      %c0_18 = arith.constant 0 : index
      %c0_19 = arith.constant 0 : index
      %39 = vector.load %arg4[%c0_18, %c0_19] : memref<128x512xf32, #tpu.memory_space<vmem>>, vector<128x128xf32>
      %cst_20 = arith.constant -1.000000e+30 : f32
      %40 = vector.broadcast %cst_20 : f32 to vector<128x128xf32>
      %41 = arith.select %38, %7, %40 : vector<128x128xi1>, vector<128x128xf32>
      %42 = arith.maximumf %39, %41 : vector<128x128xf32>
      %c0_21 = arith.constant 0 : index
      %c128_22 = arith.constant 128 : index
      %43 = vector.load %arg4[%c0_21, %c128_22] : memref<128x512xf32, #tpu.memory_space<vmem>>, vector<128x128xf32>
      %44 = arith.subf %39, %42 : vector<128x128xf32>
      %45 = math.exp %44 : vector<128x128xf32>
      %46 = arith.mulf %43, %45 : vector<128x128xf32>
      %c0_23 = arith.constant 0 : index
      %c256 = arith.constant 256 : index
      %47 = vector.load %arg4[%c0_23, %c256] : memref<128x512xf32, #tpu.memory_space<vmem>>, vector<128x128xf32>
      %c0_24 = arith.constant 0 : index
      %c384 = arith.constant 384 : index
      %48 = vector.load %arg4[%c0_24, %c384] : memref<128x512xf32, #tpu.memory_space<vmem>>, vector<128x128xf32>
      %cst_25 = arith.constant 0.000000e+00 : f32
      %49 = vector.broadcast %cst_25 : f32 to vector<128x128xf32>
      %50 = arith.maximumf %10, %49 : vector<128x128xf32>
      %51 = arith.subf %7, %42 : vector<128x128xf32>
      %52 = math.exp %51 : vector<128x128xf32>
      %cst_26 = arith.constant 0.000000e+00 : f32
      %53 = vector.broadcast %cst_26 : f32 to vector<128x128xf32>
      %54 = arith.select %38, %52, %53 : vector<128x128xi1>, vector<128x128xf32>
      %55 = arith.addf %46, %54 : vector<128x128xf32>
      %cst_27 = arith.constant 0.000000e+00 : f32
      %56 = vector.broadcast %cst_27 : f32 to vector<128x128xf32>
      %57 = arith.select %38, %50, %56 : vector<128x128xi1>, vector<128x128xf32>
      %58 = arith.addf %47, %57 : vector<128x128xf32>
      %59 = arith.mulf %57, %7 : vector<128x128xf32>
      %60 = arith.addf %48, %59 : vector<128x128xf32>
      %c0_28 = arith.constant 0 : index
      %c0_29 = arith.constant 0 : index
      %61 = vector.load %arg4[%c0_28, %c0_29] : memref<128x512xf32, #tpu.memory_space<vmem>>, vector<128x128xf32>
      tpu.vector_store %arg4[%c0_28, %c0_29], %42 {strides = array<i32>} : memref<128x512xf32, #tpu.memory_space<vmem>>, vector<128x128xf32>,
      %c0_30 = arith.constant 0 : index
      %c128_31 = arith.constant 128 : index
      %62 = vector.load %arg4[%c0_30, %c128_31] : memref<128x512xf32, #tpu.memory_space<vmem>>, vector<128x128xf32>
      tpu.vector_store %arg4[%c0_30, %c128_31], %55 {strides = array<i32>} : memref<128x512xf32, #tpu.memory_space<vmem>>, vector<128x128xf32>,
      %c0_32 = arith.constant 0 : index
      %c256_33 = arith.constant 256 : index
      %63 = vector.load %arg4[%c0_32, %c256_33] : memref<128x512xf32, #tpu.memory_space<vmem>>, vector<128x128xf32>
      tpu.vector_store %arg4[%c0_32, %c256_33], %58 {strides = array<i32>} : memref<128x512xf32, #tpu.memory_space<vmem>>, vector<128x128xf32>,
      %c0_34 = arith.constant 0 : index
      %c384_35 = arith.constant 384 : index
      %64 = vector.load %arg4[%c0_34, %c384_35] : memref<128x512xf32, #tpu.memory_space<vmem>>, vector<128x128xf32>
      tpu.vector_store %arg4[%c0_34, %c384_35], %60 {strides = array<i32>} : memref<128x512xf32, #tpu.memory_space<vmem>>, vector<128x128xf32>,
    } else {
    }
    %true = arith.constant true
    %24 = arith.xori %21, %true : i1
    %25 = arith.extui %24 : i1 to i32
    %c0_i32_15 = arith.constant 0 : i32
    %26 = arith.cmpi ne, %25, %c0_i32_15 : i32
    scf.if %26 {
      %c0_16 = arith.constant 0 : index
      %c0_17 = arith.constant 0 : index
      %27 = vector.load %arg4[%c0_16, %c0_17] : memref<128x512xf32, #tpu.memory_space<vmem>>, vector<128x128xf32>
      %28 = arith.maximumf %27, %7 : vector<128x128xf32>
      %c0_18 = arith.constant 0 : index
      %c128_19 = arith.constant 128 : index
      %29 = vector.load %arg4[%c0_18, %c128_19] : memref<128x512xf32, #tpu.memory_space<vmem>>, vector<128x128xf32>
      %30 = arith.subf %27, %28 : vector<128x128xf32>
      %31 = math.exp %30 : vector<128x128xf32>
      %32 = arith.mulf %29, %31 : vector<128x128xf32>
      %c0_20 = arith.constant 0 : index
      %c256 = arith.constant 256 : index
      %33 = vector.load %arg4[%c0_20, %c256] : memref<128x512xf32, #tpu.memory_space<vmem>>, vector<128x128xf32>
      %c0_21 = arith.constant 0 : index
      %c384 = arith.constant 384 : index
      %34 = vector.load %arg4[%c0_21, %c384] : memref<128x512xf32, #tpu.memory_space<vmem>>, vector<128x128xf32>
      %cst_22 = arith.constant 0.000000e+00 : f32
      %35 = vector.broadcast %cst_22 : f32 to vector<128x128xf32>
      %36 = arith.maximumf %10, %35 : vector<128x128xf32>
      %37 = arith.subf %7, %28 : vector<128x128xf32>
      %38 = math.exp %37 : vector<128x128xf32>
      %39 = arith.addf %32, %38 : vector<128x128xf32>
      %40 = arith.addf %33, %36 : vector<128x128xf32>
      %41 = arith.mulf %36, %7 : vector<128x128xf32>
      %42 = arith.addf %34, %41 : vector<128x128xf32>
      %c0_23 = arith.constant 0 : index
      %c0_24 = arith.constant 0 : index
      %43 = vector.load %arg4[%c0_23, %c0_24] : memref<128x512xf32, #tpu.memory_space<vmem>>, vector<128x128xf32>
      tpu.vector_store %arg4[%c0_23, %c0_24], %28 {strides = array<i32>} : memref<128x512xf32, #tpu.memory_space<vmem>>, vector<128x128xf32>,
      %c0_25 = arith.constant 0 : index
      %c128_26 = arith.constant 128 : index
      %44 = vector.load %arg4[%c0_25, %c128_26] : memref<128x512xf32, #tpu.memory_space<vmem>>, vector<128x128xf32>
      tpu.vector_store %arg4[%c0_25, %c128_26], %39 {strides = array<i32>} : memref<128x512xf32, #tpu.memory_space<vmem>>, vector<128x128xf32>,
      %c0_27 = arith.constant 0 : index
      %c256_28 = arith.constant 256 : index
      %45 = vector.load %arg4[%c0_27, %c256_28] : memref<128x512xf32, #tpu.memory_space<vmem>>, vector<128x128xf32>
      tpu.vector_store %arg4[%c0_27, %c256_28], %40 {strides = array<i32>} : memref<128x512xf32, #tpu.memory_space<vmem>>, vector<128x128xf32>,
      %c0_29 = arith.constant 0 : index
      %c384_30 = arith.constant 384 : index
      %46 = vector.load %arg4[%c0_29, %c384_30] : memref<128x512xf32, #tpu.memory_space<vmem>>, vector<128x128xf32>
      tpu.vector_store %arg4[%c0_29, %c384_30], %42 {strides = array<i32>} : memref<128x512xf32, #tpu.memory_space<vmem>>, vector<128x128xf32>,
    } else {
    }
    return
  }
  func.func @transform_0(%arg0: i32, %arg1: i32) -> (i32, i32) {
    %c0_i32 = arith.constant 0 : i32
    %c0_i32_0 = arith.constant 0 : i32
    return %arg0, %c0_i32 : i32, i32
  }
  func.func @transform_1(%arg0: i32, %arg1: i32) -> (i32, i32) {
    %c0_i32 = arith.constant 0 : i32
    %c0_i32_0 = arith.constant 0 : i32
    return %arg1, %c0_i32 : i32, i32
  }
  func.func @transform_2(%arg0: i32, %arg1: i32) -> (i32, i32) {
    %c0_i32 = arith.constant 0 : i32
    %c0_i32_0 = arith.constant 0 : i32
    return %arg0, %c0_i32 : i32, i32
  }
}

</mosaic_0001>

<bundles_post_ra>
// kernel: tpu_custom_call.1
= control target key start
LH: loop header
LB: loop body
LE: loop exit
PB: predicated region body
PF: predicated region fallthrough
CT: control target
= control target key end

     0   :  { %7 = vsyncpa [#allocation3], 0  ;;  %s2118_s0 = inlined_call_operand.hbm [shape: bf16[128,256], index: 0, kind: input, shape index: {}]   ;;  %s2119_s1 = inlined_call_operand.hbm [shape: bf16[128,256], index: 1, kind: input, shape index: {}]   ;;  %s2120_s2 = inlined_call_operand.hbm [shape: f32[128,512], index: 2, kind: output, shape index: {}]  }
   0x1   :  { %8 = vsyncpa [#allocation6], 0 }
   0x2   :  { %9 = vsyncpa [#allocation4], 0  ;;  %s1706_s9 = smov [#allocation2]   ;;  %s1634_s13 = scalar_lea.hbm %s2118_s0, 2048 }
   0x3   :  { %s15_s10 = sshll.u32 %s1706_s9, 4  ;;  %p1635_p0 = scmp.ne.s32.totalorder %s2118_s0, %s1634_s13  ;;  %s16_s10 = int_to_ptr.vmem [resolvable:$true] %s15_s10 }
   0x4   :  { %p1638_p1 = scmp.lt.u32.totalorder %s1634_s13, %s2118_s0 }
   0x6   :  { %p1640_p2 = pnand %p1638_p1, %p1635_p0 }
   0x8   :  { %1643 = shalt.err (!%p1640_p2)
}
   0x9   :  { %s1644_s18 = scalar_lea.vmem %s16_s10, 2048  ;;  %p1649_p4 = scmp.lt.s32.totalorder %s16_s10, %s16_s10 }
   0xa   :  { %p1645_p3 = scmp.ne.s32.totalorder %s16_s10, %s1644_s18  ;;  %p1650_p5 = scmp.lt.s32.totalorder %s1644_s18, %s1644_s18 }
   0xc   :  { %p1651_p6 = por %p1650_p5, %p1649_p4 }
   0xe   :  { %p1652_p7 = pnand %p1651_p6, %p1645_p3 }
  0x10   :  { %1655 = shalt.err (!%p1652_p7)
}
  0x11   :  { %s1707_s19 = smov 128   ;;  %s1708_s20 = smov 8  }
  0x12   :  { %21 = dma.hbm_to_vmem [thread:$0]  %s2118_s0, 2048, %s16_s10, [#allocation3], %s1707_s19, %s1707_s19, %s1708_s20  }
  0x13   :  { %s1709_s23 = smov [#allocation5]   ;;  %s1656_s27 = scalar_lea.hbm %s2119_s1, 2048 }
  0x14   :  { %s27_s24 = sshll.u32 %s1709_s23, 4  ;;  %p1657_p8 = scmp.ne.s32.totalorder %s2119_s1, %s1656_s27  ;;  %s28_s24 = int_to_ptr.vmem [resolvable:$true] %s27_s24 }
  0x15   :  { %p1660_p9 = scmp.lt.u32.totalorder %s1656_s27, %s2119_s1 }
  0x17   :  { %p1662_p10 = pnand %p1660_p9, %p1657_p8 }
  0x19   :  { %1665 = shalt.err (!%p1662_p10)
}
  0x1a   :  { %s1666_s4 = scalar_lea.vmem %s28_s24, 2048  ;;  %p1671_p12 = scmp.lt.s32.totalorder %s28_s24, %s28_s24 }
  0x1b   :  { %p1667_p11 = scmp.ne.s32.totalorder %s28_s24, %s1666_s4  ;;  %p1672_p13 = scmp.lt.s32.totalorder %s1666_s4, %s1666_s4 }
  0x1d   :  { %p1673_p0 = por %p1672_p13, %p1671_p12 }
  0x1f   :  { %p1674_p1 = pnand %p1673_p0, %p1667_p11 }
  0x21   :  { %1677 = shalt.err (!%p1674_p1)
}
  0x22   :  { %33 = dma.hbm_to_vmem [thread:$0]  %s2119_s1, 2048, %s28_s24, [#allocation6], %s1707_s19, %s1707_s19, %s1708_s20  }
  0x23   :  { %1700 = dma.done.wait [#allocation3], 2048  }
  0x24   :  { %1701 = vsyncadd [#allocation3], 4294965248 }
  0x25   :  { %1702 = dma.done.wait [#allocation6], 2048  }
  0x26   :  { %1703 = vsyncadd [#allocation6], 4294965248  ;;  %v1538_v0 = vld [vmem:[#allocation5] ss:$8 sps:$4 sm:$0xff]   ;;  %v1539_v1 = vld [vmem:[#allocation5 + $0x4] ss:$8 sps:$4 sm:$0xff]   ;;  %v589_v32 = vlaneseq }
  0x27   :  { %1465 = vmatprep.subr.bf16.mxu0 %v1538_v0  ;;  %v1540_v2 = vld [vmem:[#allocation5 + $0x10] ss:$8 sps:$4 sm:$0xff]   ;;  %1497 = vmatprep.subr.bf16.mxu1 %v1539_v1  ;;  %v1541_v3 = vld [vmem:[#allocation5 + $0x14] ss:$8 sps:$4 sm:$0xff]   ;;  %v1542_v4 = vld [vmem:[#allocation5 + $0x20] ss:$8 sps:$4 sm:$0xff]  }
  0x28   :  { %1466 = vmatpush3.bf16.xpose.msra.mxu0 %v1538_v0  ;;  %1498 = vmatpush3.bf16.xpose.msra.mxu1 %v1539_v1  ;;  %v1543_v5 = vld [vmem:[#allocation5 + $0x24] ss:$8 sps:$4 sm:$0xff]   ;;  %v1544_v6 = vld [vmem:[#allocation5 + $0x30] ss:$8 sps:$4 sm:$0xff]   ;;  %v1545_v7 = vld [vmem:[#allocation5 + $0x34] ss:$8 sps:$4 sm:$0xff]  }
  0x29   :  { %1467 = vmatprep.subr.bf16.mxu0 %v1540_v2  ;;  %1499 = vmatprep.subr.bf16.mxu1 %v1541_v3  ;;  %v1554_v8 = vld [vmem:[#allocation2] ss:$8 sps:$4 sm:$0xff]   ;;  %v1555_v9 = vld [vmem:[#allocation2 + $0x4] ss:$8 sps:$4 sm:$0xff]   ;;  %v1548_v12 = vld [vmem:[#allocation5 + $0x50] ss:$8 sps:$4 sm:$0xff]  }
  0x2a   :  { %1481 = vmatprep.mubr.bf16.mxu0 %v1554_v8  ;;  %1513 = vmatprep.mubr.bf16.mxu1 %v1555_v9  ;;  %v1546_v10 = vld [vmem:[#allocation5 + $0x40] ss:$8 sps:$4 sm:$0xff]   ;;  %v1547_v11 = vld [vmem:[#allocation5 + $0x44] ss:$8 sps:$4 sm:$0xff]   ;;  %v1549_v13 = vld [vmem:[#allocation5 + $0x54] ss:$8 sps:$4 sm:$0xff]  }
  0x2b   :  { %v1550_v14 = vld [vmem:[#allocation5 + $0x60] ss:$8 sps:$4 sm:$0xff]   ;;  %v1551_v15 = vld [vmem:[#allocation5 + $0x64] ss:$8 sps:$4 sm:$0xff]   ;;  %v1552_v16 = vld [vmem:[#allocation5 + $0x70] ss:$8 sps:$4 sm:$0xff]  }
  0x2c   :  { %v1553_v17 = vld [vmem:[#allocation5 + $0x74] ss:$8 sps:$4 sm:$0xff]   ;;  %v1556_v18 = vld [vmem:[#allocation2 + $0x10] ss:$8 sps:$4 sm:$0xff]   ;;  %v1558_v20 = vld [vmem:[#allocation2 + $0x20] ss:$8 sps:$4 sm:$0xff]  }
  0x2d   :  { %v1557_v19 = vld [vmem:[#allocation2 + $0x14] ss:$8 sps:$4 sm:$0xff]   ;;  %v1559_v21 = vld [vmem:[#allocation2 + $0x24] ss:$8 sps:$4 sm:$0xff]   ;;  %v1560_v22 = vld [vmem:[#allocation2 + $0x30] ss:$8 sps:$4 sm:$0xff]  }
  0x2e   :  { %v1561_v23 = vld [vmem:[#allocation2 + $0x34] ss:$8 sps:$4 sm:$0xff]   ;;  %v1562_v24 = vld [vmem:[#allocation2 + $0x40] ss:$8 sps:$4 sm:$0xff]   ;;  %v1563_v25 = vld [vmem:[#allocation2 + $0x44] ss:$8 sps:$4 sm:$0xff]  }
  0x2f   :  { %v1564_v26 = vld [vmem:[#allocation2 + $0x50] ss:$8 sps:$4 sm:$0xff]   ;;  %v1565_v27 = vld [vmem:[#allocation2 + $0x54] ss:$8 sps:$4 sm:$0xff]   ;;  %v1566_v28 = vld [vmem:[#allocation2 + $0x60] ss:$8 sps:$4 sm:$0xff]  }
  0x30   :  { %1468 = vmatpush3.bf16.xpose.msra.mxu0 %v1540_v2  ;;  %1500 = vmatpush3.bf16.xpose.msra.mxu1 %v1541_v3  ;;  %v1567_v29 = vld [vmem:[#allocation2 + $0x64] ss:$8 sps:$4 sm:$0xff]   ;;  %v1568_v30 = vld [vmem:[#allocation2 + $0x70] ss:$8 sps:$4 sm:$0xff]   ;;  %v1569_v31 = vld [vmem:[#allocation2 + $0x74] ss:$8 sps:$4 sm:$0xff]  }
  0x31   :  { %1469 = vmatprep.subr.bf16.mxu0 %v1542_v4  ;;  %1501 = vmatprep.subr.bf16.mxu1 %v1543_v5  ;;  %v590_v33 = vshrl.u32 %v589_v32, 7  ;;  %v1752_v35 = vand.u32 127, %v589_v32  ;;  %s1710_s1 = smov [#allocation7]  }
  0x32   :  { %s1388_s6 = sshll.u32 %s1710_s1, 4  ;;  %s1389_s6 = int_to_ptr.vmem [resolvable:$true] %s1388_s6 }
  0x33   :  { %v592_v34 = vadd.s32 16, %v590_v33  ;;  %v593_v36 = vadd.s32 24, %v590_v33  ;;  %vm627_vm0 = vcmp.lt.s32.totalorder %v1752_v35, 8  ;;  %v591_v37 = vadd.s32 8, %v590_v33  ;;  %s1678_s7 = scalar_lea.vmem %s1389_s6, 8192  ;;  %p1683_p3 = scmp.lt.s32.totalorder %s1389_s6, %s1389_s6 }
  0x34   :  { %vm628_vm2 = vcmp.ne.s32.totalorder %v1752_v35, %v590_v33  ;;  %v1758_v38 = vadd.s32 48, %v590_v33  ;;  %v1760_v39 = vadd.s32 32, %v590_v33  ;;  %v1762_v40 = vadd.s32 56, %v590_v33  ;;  %p1679_p2 = scmp.ne.s32.totalorder %s1389_s6, %s1678_s7  ;;  %p1684_p4 = scmp.lt.s32.totalorder %s1678_s7, %s1678_s7 }
  0x35   :  { %vm630_vm1 = vcmp.ne.s32.totalorder %v1752_v35, %v592_v34  ;;  %vm631_vm3 = vcmp.ne.s32.totalorder %v1752_v35, %v593_v36  ;;  %v1764_v41 = vadd.s32 40, %v590_v33  ;;  %v1766_v42 = vadd.s32 80, %v590_v33  ;;  %vm1786_vm5 = vmand %vm627_vm0, %vm628_vm2 }
  0x36   :  { %vm1770_vm4 = vmand %vm627_vm0, %vm630_vm1  ;;  %v1774_v45 = vadd.s32 64, %v590_v33  ;;  %v1776_v46 = vadd.s32 88, %v590_v33  ;;  %v1778_v47 = vadd.s32 72, %v590_v33  ;;  %v1780_v48 = vadd.s32 112, %v590_v33  ;;  %p1685_p5 = por %p1684_p4, %p1683_p3 }
  0x37   :  { %vm629_vm6 = vcmp.ne.s32.totalorder %v1752_v35, %v591_v37  ;;  %v1791_v53 = vadd.s32 96, %v590_v33  ;;  %v1793_v54 = vadd.s32 120, %v590_v33  ;;  %vm634_vm7 = vcmp.ne.s32.totalorder %v1752_v35, %v1758_v38  ;;  %vm1811_vm9 = vmand %vm627_vm0, %vm631_vm3 }
  0x38   :  { %1470 = vmatpush3.bf16.xpose.msra.mxu0 %v1542_v4  ;;  %1502 = vmatpush3.bf16.xpose.msra.mxu1 %v1543_v5  ;;  %v1797_v59 = vadd.s32 104, %v590_v33  ;;  %vm632_vm8 = vcmp.ne.s32.totalorder %v1752_v35, %v1760_v39  ;;  %vm1823_vm10 = vmand %vm627_vm0, %vm629_vm6  ;;  %vm635_vm11 = vcmp.ne.s32.totalorder %v1752_v35, %v1762_v40  ;;  %vm633_vm13 = vcmp.ne.s32.totalorder %v1752_v35, %v1764_v41  ;;  %p1686_p6 = pnand %p1685_p5, %p1679_p2 }
  0x39   :  { %1471 = vmatprep.subr.bf16.mxu0 %v1544_v6  ;;  %1503 = vmatprep.subr.bf16.mxu1 %v1545_v7  ;;  %vm1846_vm12 = vmand %vm627_vm0, %vm634_vm7  ;;  %vm638_vm15 = vcmp.ne.s32.totalorder %v1752_v35, %v1766_v42  ;;  %vm636_vm2 = vcmp.ne.s32.totalorder %v1752_v35, %v1774_v45  ;;  %vm637_vm6 = vcmp.ne.s32.totalorder %v1752_v35, %v1778_v47 }
  0x3a   :  { %vm1859_vm14 = vmand %vm627_vm0, %vm632_vm8  ;;  %vm642_vm8 = vcmp.ne.s32.totalorder %v1752_v35, %v1780_v48 }
  0x3b   :  { %vm1896_vm1 = vmand %vm627_vm0, %vm635_vm11 }
  0x3c   :  { %vm1912_vm3 = vmand %vm627_vm0, %vm633_vm13 }
  0x3d   :  { %vm1972_vm7 = vmand %vm627_vm0, %vm636_vm2 }
  0x3e   :  { %vm2008_vm11 = vmand %vm627_vm0, %vm637_vm6 }
  0x3f   :  { %vm2030_vm13 = vmand %vm627_vm0, %vm642_vm8 }
  0x40   :  { %1472 = vmatpush3.bf16.xpose.msra.mxu0 %v1544_v6  ;;  %1504 = vmatpush3.bf16.xpose.msra.mxu1 %v1545_v7 }
  0x41   :  { %1473 = vmatprep.subr.bf16.mxu0 %v1546_v10  ;;  %1505 = vmatprep.subr.bf16.mxu1 %v1547_v11 }
  0x48   :  { %1474 = vmatpush3.bf16.xpose.msra.mxu0 %v1546_v10  ;;  %1506 = vmatpush3.bf16.xpose.msra.mxu1 %v1547_v11 }
  0x49   :  { %1475 = vmatprep.subr.bf16.mxu0 %v1548_v12  ;;  %1507 = vmatprep.subr.bf16.mxu1 %v1549_v13 }
  0x50   :  { %1476 = vmatpush3.bf16.xpose.msra.mxu0 %v1548_v12  ;;  %1508 = vmatpush3.bf16.xpose.msra.mxu1 %v1549_v13 }
  0x51   :  { %1477 = vmatprep.subr.bf16.mxu0 %v1550_v14  ;;  %1509 = vmatprep.subr.bf16.mxu1 %v1551_v15 }
  0x58   :  { %1478 = vmatpush3.bf16.xpose.msra.mxu0 %v1550_v14  ;;  %1510 = vmatpush3.bf16.xpose.msra.mxu1 %v1551_v15 }
  0x59   :  { %1479 = vmatprep.subr.bf16.mxu0 %v1552_v16  ;;  %1511 = vmatprep.subr.bf16.mxu1 %v1553_v17 }
  0x60   :  { %1480 = vmatpush3.bf16.xpose.msra.mxu0 %v1552_v16  ;;  %1512 = vmatpush3.bf16.xpose.msra.mxu1 %v1553_v17 }
  0x67   :  { %1482 = vmatmul.mubr.bf16.vlgmr.msra.gmra.mrb[0].mxu0 %v1556_v18  ;;  %1514 = vmatmul.mubr.bf16.vlgmr.msra.gmra.mrb[0].mxu1 %v1557_v19 }
  0x68   :  { %1485 = vmatprep.mubr.bf16.mxu0 %v1558_v20  ;;  %1517 = vmatprep.mubr.bf16.mxu1 %v1559_v21 }
  0x6f   :  { %1486 = vmatmul.mubr.bf16.gmra.mrb[4].mxu0 %v1560_v22  ;;  %1518 = vmatmul.mubr.bf16.gmra.mrb[4].mxu1 %v1561_v23 }
  0x70   :  { %1489 = vmatprep.mubr.bf16.mxu0 %v1562_v24  ;;  %1521 = vmatprep.mubr.bf16.mxu1 %v1563_v25 }
  0x77   :  { %1490 = vmatmul.mubr.bf16.gmra.mrb[8].mxu0 %v1564_v26  ;;  %1522 = vmatmul.mubr.bf16.gmra.mrb[8].mxu1 %v1565_v27 }
  0x78   :  { %1493 = vmatprep.mubr.bf16.mxu0 %v1566_v28  ;;  %1525 = vmatprep.mubr.bf16.mxu1 %v1567_v29 }
  0x7f   :  { %1494 = vmatmul.mubr.bf16.gmra.mrb[12].mxu0 %v1568_v30  ;;  %1526 = vmatmul.mubr.bf16.gmra.mrb[12].mxu1 %v1569_v31 }
 0x13a   :  { %v1483_v43 = vpop.f32.mrb[0].mxu0  ;;  %v1515_v50 = vpop.f32.mrb[0].mxu1 }
 0x13b   :  { %v336_v49 = vmul.f32 14.285714, %v1483_v43  ;;  %v271_v51 = vpop.f32.mrb[1].mxu0  ;;  %v822_v55 = vmax.f32 %v1515_v50, 0.0  ;;  %v512_v57 = vpop.f32.mrb[1].mxu1 }
 0x13c   :  { %v334_v56 = vmul.f32 14.285714, %v271_v51  ;;  %v1484_v58 = vpop.f32.mrb[2].mxu0  ;;  %v820_v61 = vmax.f32 %v512_v57, 0.0  ;;  %v1516_v63 = vpop.f32.mrb[2].mxu1 }
 0x13d   :  { %v678_v60 = vsel %vm1770_vm4, %v336_v49, -1e+30  ;;  %v337_v62 = vmul.f32 14.285714, %v1484_v58  ;;  %v918_v1 = vsel %vm1770_vm4, %v822_v55, 0.0  ;;  %v823_v4 = vmax.f32 %v1516_v63, 0.0 }
 0x13e   :  { %v694_v0 = vmax.f32 %v678_v60, -1e+30  ;;  %v676_v2 = vsel %vm1786_vm5, %v334_v56, -1e+30  ;;  %v274_v5 = vpop.f32.mrb[3].mxu0  ;;  %v515_v6 = vpop.f32.mrb[3].mxu1  ;;  %v950_v7 = vmul.f32 %v918_v1, %v336_v49 }
 0x13f   :  { %v692_v8 = vmax.f32 %v676_v2, -1e+30  ;;  %v916_v9 = vsel %vm1786_vm5, %v820_v61, 0.0  ;;  %1014 = vst [vmem:[#allocation7 + $0x50] sm:$0xff] %v918_v1  ;;  %v679_v15 = vsel %vm1811_vm9, %v337_v62, -1e+30 }
 0x140   :  { %v726_v10 = vsub.f32 -1e+30, %v694_v0  ;;  %v838_v11 = vsub.f32 %v336_v49, %v694_v0  ;;  %982 = vst [vmem:[#allocation7 + $0x40] sm:$0xff] %v694_v0  ;;  %v948_v12 = vmul.f32 %v916_v9, %v334_v56  ;;  %1012 = vst [vmem:[#allocation7 + $0x10] sm:$0xff] %v916_v9  ;;  %v695_v18 = vmax.f32 %v679_v15, -1e+30 }
 0x141   :  { %v724_v13 = vsub.f32 -1e+30, %v692_v8  ;;  %v836_v14 = vsub.f32 %v334_v56, %v692_v8  ;;  %980 = vst [vmem:[#allocation7] sm:$0xff] %v692_v8  ;;  %1030 = vst [vmem:[#allocation7 + $0x58] sm:$0xff] %v950_v7  ;;  %v919_v23 = vsel %vm1811_vm9, %v823_v4, 0.0  ;;  %v821_v24 = vmax.f32 %v515_v6, 0.0 }
 0x142   :  { %v744_v16 = vmul.f32 1.442695, %v726_v10  ;;  %v856_v17 = vmul.f32 1.442695, %v838_v11  ;;  %v1487_v20 = vpop.f32.mrb[4].mxu0  ;;  %1028 = vst [vmem:[#allocation7 + $0x18] sm:$0xff] %v948_v12  ;;  %v839_v26 = vsub.f32 %v337_v62, %v695_v18  ;;  %v951_v29 = vmul.f32 %v919_v23, %v337_v62 }
 0x143   :  { %v740_v21 = vmul.f32 1.442695, %v724_v13  ;;  %v852_v22 = vmul.f32 1.442695, %v836_v14  ;;  %v727_v25 = vsub.f32 -1e+30, %v695_v18 }
 0x144   :  { %1570 = vpow2.f32 %v744_v16  ;;  %983 = vst [vmem:[#allocation7 + $0x60] sm:$0xff] %v695_v18  ;;  %v1519_v27 = vpop.f32.mrb[4].mxu1  ;;  %v287_v28 = vpop.f32.mrb[5].mxu0  ;;  %v335_v30 = vmul.f32 14.285714, %v274_v5  ;;  %v917_v31 = vsel %vm1823_vm10, %v821_v24, 0.0 }
 0x145   :  { %1572 = vpow2.f32 %v856_v17  ;;  %v528_v32 = vpop.f32.mrb[5].mxu1  ;;  %v1831_v33 = vpop.f32.mrb[6].mxu0  ;;  %v746_v34 = vmul.f32 1.442695, %v727_v25  ;;  %v858_v36 = vmul.f32 1.442695, %v839_v26 }
 0x146   :  { %1574 = vpow2.f32 %v740_v21  ;;  %1015 = vst [vmem:[#allocation7 + $0x70] sm:$0xff] %v919_v23  ;;  %v1835_v37 = vpop.f32.mrb[6].mxu1  ;;  %v1837_v43 = vpop.f32.mrb[7].mxu0  ;;  %v677_v49 = vsel %vm1823_vm10, %v335_v30, -1e+30  ;;  %v949_v50 = vmul.f32 %v917_v31, %v335_v30  ;;  %1013 = vst [vmem:[#allocation7 + $0x30] sm:$0xff] %v917_v31 }
 0x147   :  { %1576 = vpow2.f32 %v852_v22  ;;  %v1850_v55 = vpop.f32.mrb[7].mxu1  ;;  %v693_v56 = vmax.f32 %v677_v49, -1e+30  ;;  %v340_v57 = vmul.f32 14.285714, %v1487_v20  ;;  %v826_v58 = vmax.f32 %v1519_v27, 0.0 }
 0x148   :  { %1578 = vpow2.f32 %v746_v34  ;;  %1031 = vst [vmem:[#allocation7 + $0x78] sm:$0xff] %v951_v29  ;;  %v338_v60 = vmul.f32 14.285714, %v287_v28  ;;  %v824_v61 = vmax.f32 %v528_v32, 0.0  ;;  %1029 = vst [vmem:[#allocation7 + $0x38] sm:$0xff] %v949_v50  ;;  %v827_v40 = vmax.f32 %v1835_v37, 0.0 }
 0x149   :  { %1580 = vpow2.f32 %v858_v36  ;;  %v725_v62 = vsub.f32 -1e+30, %v693_v56  ;;  %v837_v63 = vsub.f32 %v335_v30, %v693_v56  ;;  %981 = vst [vmem:[#allocation7 + $0x20] sm:$0xff] %v693_v56  ;;  %v682_v0 = vsel %vm1846_vm12, %v340_v57, -1e+30 }
 0x14a   :  { %v922_v1 = vsel %vm1846_vm12, %v826_v58, 0.0  ;;  %v1867_v39 = vpop.f32.mrb[8].mxu0  ;;  %v698_v2 = vmax.f32 %v682_v0, -1e+30  ;;  %v680_v5 = vsel %vm1859_vm14, %v338_v60, -1e+30 }
 0x14b   :  { %v954_v4 = vmul.f32 %v922_v1, %v340_v57  ;;  %v1871_v6 = vpop.f32.mrb[8].mxu1  ;;  %v1875_v7 = vpop.f32.mrb[9].mxu0  ;;  %v742_v8 = vmul.f32 1.442695, %v725_v62  ;;  %v854_v9 = vmul.f32 1.442695, %v837_v63 }
 0x14c   :  { %v696_v10 = vmax.f32 %v680_v5, -1e+30  ;;  %v920_v11 = vsel %vm1859_vm14, %v824_v61, 0.0  ;;  %v1879_v12 = vpop.f32.mrb[9].mxu1  ;;  %v730_v13 = vsub.f32 -1e+30, %v698_v2  ;;  %v842_v14 = vsub.f32 %v340_v57, %v698_v2 }
 0x14d   :  { %986 = vst [vmem:[#allocation7 + $0xc0] sm:$0xff] %v698_v2  ;;  %1018 = vst [vmem:[#allocation7 + $0xd0] sm:$0xff] %v922_v1  ;;  %v1881_v15 = vpop.f32.mrb[10].mxu0  ;;  %v1883_v16 = vpop.f32.mrb[10].mxu1  ;;  %1582 = vpow2.f32 %v742_v8  ;;  %v952_v21 = vmul.f32 %v920_v11, %v338_v60  ;;  %v341_v50 = vmul.f32 14.285714, %v1831_v33 }
 0x14e   :  { %v1571_v17 = vpop.eup %1570  ;;  %v728_v18 = vsub.f32 -1e+30, %v696_v10  ;;  %v840_v20 = vsub.f32 %v338_v60, %v696_v10  ;;  %984 = vst [vmem:[#allocation7 + $0x80] sm:$0xff] %v696_v10  ;;  %v1885_v22 = vpop.f32.mrb[11].mxu0  ;;  %1584 = vpow2.f32 %v854_v9  ;;  %v752_v26 = vmul.f32 1.442695, %v730_v13 }
 0x14f   :  { %v1887_v23 = vpop.f32.mrb[11].mxu1  ;;  %v1573_v24 = vpop.eup %1572  ;;  %v774_v25 = vmul.f32 0.0, %v1571_v17  ;;  %v864_v27 = vmul.f32 1.442695, %v842_v14  ;;  %1034 = vst [vmem:[#allocation7 + $0xd8] sm:$0xff] %v954_v4  ;;  %1016 = vst [vmem:[#allocation7 + $0x90] sm:$0xff] %v920_v11 }
 0x150   :  { %v1575_v28 = vpop.eup %1574  ;;  %v886_v29 = vsel %vm1770_vm4, %v1573_v24, 0.0  ;;  %v748_v30 = vmul.f32 1.442695, %v728_v18  ;;  %v860_v31 = vmul.f32 1.442695, %v840_v20  ;;  %1586 = vpow2.f32 %v752_v26  ;;  %1032 = vst [vmem:[#allocation7 + $0x98] sm:$0xff] %v952_v21 }
 0x151   :  { %v1577_v34 = vpop.eup %1576  ;;  %v902_v36 = vadd.f32 %v886_v29, %v774_v25  ;;  %v772_v49 = vmul.f32 0.0, %v1575_v28  ;;  %1588 = vpow2.f32 %v864_v27  ;;  %v339_v57 = vmul.f32 14.285714, %v1837_v43 }
 0x152   :  { %v1579_v44 = vpop.eup %1578  ;;  %v884_v56 = vsel %vm1786_vm5, %v1577_v34, 0.0  ;;  %v1916_v58 = vpop.f32.mrb[12].mxu0  ;;  %1590 = vpow2.f32 %v748_v30  ;;  %v683_v37 = vsel %vm1896_vm1, %v341_v50, -1e+30  ;;  %v923_v0 = vsel %vm1896_vm1, %v827_v40, 0.0  ;;  %vm1946_vm5 = vmand %vm627_vm0, %vm638_vm15 }
 0x153   :  { %v1581_v60 = vpop.eup %1580  ;;  %998 = vst [vmem:[#allocation7 + $0x48] sm:$0xff] %v902_v36  ;;  %v900_v52 = vadd.f32 %v884_v56, %v772_v49  ;;  %v775_v61 = vmul.f32 0.0, %v1579_v44  ;;  %v1920_v43 = vpop.f32.mrb[12].mxu1  ;;  %1592 = vpow2.f32 %v860_v31  ;;  %v699_v63 = vmax.f32 %v683_v37, -1e+30  ;;  %1019 = vst [vmem:[#allocation7 + $0xf0] sm:$0xff] %v923_v0 }
 0x154   :  { %v1922_v62 = vpop.f32.mrb[13].mxu0  ;;  %v887_v41 = vsel %vm1811_vm9, %v1581_v60, 0.0  ;;  %v1928_v1 = vpop.f32.mrb[13].mxu1  ;;  %v955_v5 = vmul.f32 %v923_v0, %v341_v50  ;;  %v681_v8 = vsel %vm1912_vm3, %v339_v57, -1e+30  ;;  %vm639_vm4 = vcmp.ne.s32.totalorder %v1752_v35, %v1776_v46 }
 0x155   :  { %v1930_v2 = vpop.f32.mrb[14].mxu0  ;;  %996 = vst [vmem:[#allocation7 + $0x8] sm:$0xff] %v900_v52  ;;  %v903_v4 = vadd.f32 %v887_v41, %v775_v61  ;;  %v1936_v3 = vpop.f32.mrb[14].mxu1  ;;  %v731_v10 = vsub.f32 -1e+30, %v699_v63  ;;  %v843_v11 = vsub.f32 %v341_v50, %v699_v63  ;;  %987 = vst [vmem:[#allocation7 + $0xe0] sm:$0xff] %v699_v63  ;;  %vm641_vm15 = vcmp.ne.s32.totalorder %v1752_v35, %v1797_v59 }
 0x156   :  { %v1938_v9 = vpop.f32.mrb[15].mxu0  ;;  %v697_v13 = vmax.f32 %v681_v8, -1e+30  ;;  %v825_v14 = vmax.f32 %v1850_v55, 0.0  ;;  %v1950_v18 = vpop.f32.mrb[15].mxu1  ;;  %v830_v21 = vmax.f32 %v1871_v6, 0.0  ;;  %vm1991_vm9 = vmand %vm627_vm0, %vm639_vm4 }
 0x157   :  { %999 = vst [vmem:[#allocation7 + $0x68] sm:$0xff] %v903_v4  ;;  %v344_v20 = vmul.f32 14.285714, %v1867_v39  ;;  %v1955_v24 = vmul.f32 14.285714, %v1875_v7  ;;  %v1583_v42 = vpop.eup %1582  ;;  %1035 = vst [vmem:[#allocation7 + $0xf8] sm:$0xff] %v955_v5 }
 0x158   :  { %v754_v55 = vmul.f32 1.442695, %v731_v10  ;;  %v866_v25 = vmul.f32 1.442695, %v843_v11  ;;  %v729_v26 = vsub.f32 -1e+30, %v697_v13  ;;  %v841_v27 = vsub.f32 %v339_v57, %v697_v13  ;;  %v1585_v28 = vpop.eup %1584  ;;  %vm2086_vm2 = vmand %vm627_vm0, %vm641_vm15 }
 0x159   :  { %985 = vst [vmem:[#allocation7 + $0xa0] sm:$0xff] %v697_v13  ;;  %v773_v29 = vmul.f32 0.0, %v1583_v42  ;;  %v921_v39 = vsel %vm1912_vm3, %v825_v14, 0.0  ;;  %v686_v6 = vsel %vm1946_vm5, %v344_v20, -1e+30  ;;  %v926_v7 = vsel %vm1946_vm5, %v830_v21, 0.0 }
 0x15a   :  { %v885_v30 = vsel %vm1823_vm10, %v1585_v28, 0.0  ;;  %1594 = vpow2.f32 %v754_v55  ;;  %v750_v31 = vmul.f32 1.442695, %v729_v26  ;;  %v862_v34 = vmul.f32 1.442695, %v841_v27  ;;  %v1587_v36 = vpop.eup %1586  ;;  %1017 = vst [vmem:[#allocation7 + $0xb0] sm:$0xff] %v921_v39 }
 0x15b   :  { %v901_v49 = vadd.f32 %v885_v30, %v773_v29  ;;  %1596 = vpow2.f32 %v866_v25  ;;  %v953_v50 = vmul.f32 %v921_v39, %v339_v57  ;;  %v1589_v44 = vpop.eup %1588  ;;  %v778_v56 = vmul.f32 0.0, %v1587_v36  ;;  %1022 = vst [vmem:[#allocation7 + $0x150] sm:$0xff] %v926_v7 }
 0x15c   :  { %1598 = vpow2.f32 %v750_v31  ;;  %v702_v40 = vmax.f32 %v686_v6, -1e+30  ;;  %v1591_v19 = vpop.eup %1590  ;;  %v890_v52 = vsel %vm1846_vm12, %v1589_v44, 0.0  ;;  %v958_v57 = vmul.f32 %v926_v7, %v344_v20 }
 0x15d   :  { %997 = vst [vmem:[#allocation7 + $0x28] sm:$0xff] %v901_v49  ;;  %1600 = vpow2.f32 %v862_v34  ;;  %v1593_v61 = vpop.eup %1592  ;;  %v906_v37 = vadd.f32 %v890_v52, %v778_v56  ;;  %v776_v45 = vmul.f32 0.0, %v1591_v19  ;;  %1033 = vst [vmem:[#allocation7 + $0xb8] sm:$0xff] %v953_v50  ;;  %v684_v51 = vsel %vm1972_vm7, %v1955_v24, -1e+30 }
 0x15e   :  { %v734_v41 = vsub.f32 -1e+30, %v702_v40  ;;  %v846_v63 = vsub.f32 %v344_v20, %v702_v40  ;;  %990 = vst [vmem:[#allocation7 + $0x140] sm:$0xff] %v702_v40  ;;  %v888_v0 = vsel %vm1859_vm14, %v1593_v61, 0.0  ;;  %v828_v4 = vmax.f32 %v1879_v12, 0.0  ;;  %1038 = vst [vmem:[#allocation7 + $0x158] sm:$0xff] %v958_v57 }
 0x15f   :  { %1002 = vst [vmem:[#allocation7 + $0xc8] sm:$0xff] %v906_v37  ;;  %v904_v5 = vadd.f32 %v888_v0, %v776_v45  ;;  %v700_v11 = vmax.f32 %v684_v51, -1e+30  ;;  %vm640_vm10 = vcmp.ne.s32.totalorder %v1752_v35, %v1791_v53  ;;  %v345_v13 = vmul.f32 14.285714, %v1881_v15 }
 0x160   :  { %v760_v8 = vmul.f32 1.442695, %v734_v41  ;;  %v872_v10 = vmul.f32 1.442695, %v846_v63  ;;  %v924_v12 = vsel %vm1972_vm7, %v828_v4, 0.0  ;;  %v831_v14 = vmax.f32 %v1883_v16, 0.0  ;;  %vm2049_vm14 = vmand %vm627_vm0, %vm640_vm10 }
 0x161   :  { %v343_v20 = vmul.f32 14.285714, %v1885_v22  ;;  %1000 = vst [vmem:[#allocation7 + $0x88] sm:$0xff] %v904_v5  ;;  %v732_v46 = vsub.f32 -1e+30, %v700_v11  ;;  %v844_v21 = vsub.f32 %v1955_v24, %v700_v11  ;;  %988 = vst [vmem:[#allocation7 + $0x100] sm:$0xff] %v700_v11  ;;  %v956_v15 = vmul.f32 %v924_v12, %v1955_v24 }
 0x162   :  { %1602 = vpow2.f32 %v760_v8  ;;  %v687_v16 = vsel %vm1991_vm9, %v345_v13, -1e+30  ;;  %v927_v22 = vsel %vm1991_vm9, %v831_v14, 0.0  ;;  %1020 = vst [vmem:[#allocation7 + $0x110] sm:$0xff] %v924_v12  ;;  %vm643_vm12 = vcmp.ne.s32.totalorder %v1752_v35, %v1793_v54 }
 0x163   :  { %1604 = vpow2.f32 %v872_v10  ;;  %v756_v25 = vmul.f32 1.442695, %v732_v46  ;;  %v868_v26 = vmul.f32 1.442695, %v844_v21  ;;  %v703_v47 = vmax.f32 %v687_v16, -1e+30 }
 0x164   :  { %v1595_v55 = vpop.eup %1594  ;;  %v959_v29 = vmul.f32 %v927_v22, %v345_v13  ;;  %v685_v39 = vsel %vm2008_vm11, %v343_v20, -1e+30  ;;  %1023 = vst [vmem:[#allocation7 + $0x170] sm:$0xff] %v927_v22  ;;  %1036 = vst [vmem:[#allocation7 + $0x118] sm:$0xff] %v956_v15  ;;  %v829_v19 = vmax.f32 %v1887_v23, 0.0  ;;  %v834_v52 = vmax.f32 %v1920_v43, 0.0 }
 0x165   :  { %v1597_v27 = vpop.eup %1596  ;;  %v779_v28 = vmul.f32 0.0, %v1595_v55  ;;  %1606 = vpow2.f32 %v756_v25  ;;  %v735_v7 = vsub.f32 -1e+30, %v703_v47  ;;  %v847_v30 = vsub.f32 %v345_v13, %v703_v47  ;;  %991 = vst [vmem:[#allocation7 + $0x160] sm:$0xff] %v703_v47 }
 0x166   :  { %v1599_v6 = vpop.eup %1598  ;;  %v891_v24 = vsel %vm1896_vm1, %v1597_v27, 0.0  ;;  %1608 = vpow2.f32 %v868_v26  ;;  %v701_v32 = vmax.f32 %v685_v39, -1e+30  ;;  %1039 = vst [vmem:[#allocation7 + $0x178] sm:$0xff] %v959_v29  ;;  %v348_v33 = vmul.f32 14.285714, %v1916_v58  ;;  %vm2066_vm1 = vmand %vm627_vm0, %vm643_vm12 }
 0x167   :  { %v1601_v31 = vpop.eup %1600  ;;  %v907_v34 = vadd.f32 %v891_v24, %v779_v28  ;;  %v777_v36 = vmul.f32 0.0, %v1599_v6  ;;  %v762_v50 = vmul.f32 1.442695, %v735_v7  ;;  %v874_v44 = vmul.f32 1.442695, %v847_v30 }
 0x168   :  { %v889_v49 = vsel %vm1912_vm3, %v1601_v31, 0.0  ;;  %v733_v57 = vsub.f32 -1e+30, %v701_v32  ;;  %v845_v61 = vsub.f32 %v343_v20, %v701_v32  ;;  %989 = vst [vmem:[#allocation7 + $0x120] sm:$0xff] %v701_v32  ;;  %v346_v48 = vmul.f32 14.285714, %v1922_v62 }
 0x169   :  { %1003 = vst [vmem:[#allocation7 + $0xe8] sm:$0xff] %v907_v34  ;;  %v905_v40 = vadd.f32 %v889_v49, %v777_v36  ;;  %1610 = vpow2.f32 %v762_v50  ;;  %v925_v37 = vsel %vm2008_vm11, %v829_v19, 0.0  ;;  %v690_v45 = vsel %vm2030_vm13, %v348_v33, -1e+30 }
 0x16a   :  { %1612 = vpow2.f32 %v874_v44  ;;  %v930_v23 = vsel %vm2030_vm13, %v834_v52, 0.0  ;;  %v758_v62 = vmul.f32 1.442695, %v733_v57  ;;  %v870_v41 = vmul.f32 1.442695, %v845_v61  ;;  %1021 = vst [vmem:[#allocation7 + $0x130] sm:$0xff] %v925_v37 }
 0x16b   :  { %1001 = vst [vmem:[#allocation7 + $0xa8] sm:$0xff] %v905_v40  ;;  %v957_v63 = vmul.f32 %v925_v37, %v343_v20  ;;  %v706_v4 = vmax.f32 %v690_v45, -1e+30  ;;  %v962_v5 = vmul.f32 %v930_v23, %v348_v33  ;;  %v688_v8 = vsel %vm2049_vm14, %v346_v48, -1e+30  ;;  %1026 = vst [vmem:[#allocation7 + $0x1d0] sm:$0xff] %v930_v23 }
 0x16c   :  { %v1603_v43 = vpop.eup %1602  ;;  %1614 = vpow2.f32 %v758_v62  ;;  %v704_v14 = vmax.f32 %v688_v8, -1e+30  ;;  %v832_v20 = vmax.f32 %v1928_v1, 0.0  ;;  %v349_v46 = vmul.f32 14.285714, %v1930_v2 }
 0x16d   :  { %v1605_v0 = vpop.eup %1604  ;;  %v782_v51 = vmul.f32 0.0, %v1603_v43  ;;  %1616 = vpow2.f32 %v870_v41  ;;  %v738_v11 = vsub.f32 -1e+30, %v706_v4  ;;  %v850_v12 = vsub.f32 %v348_v33, %v706_v4  ;;  %994 = vst [vmem:[#allocation7 + $0x1c0] sm:$0xff] %v706_v4  ;;  %1037 = vst [vmem:[#allocation7 + $0x138] sm:$0xff] %v957_v63 }
 0x16e   :  { %v894_v53 = vsel %vm1946_vm5, %v1605_v0, 0.0  ;;  %v835_v55 = vmax.f32 %v1936_v3, 0.0  ;;  %1042 = vst [vmem:[#allocation7 + $0x1d8] sm:$0xff] %v962_v5  ;;  %v736_v2 = vsub.f32 -1e+30, %v704_v14  ;;  %v848_v25 = vsub.f32 %v346_v48, %v704_v14  ;;  %992 = vst [vmem:[#allocation7 + $0x180] sm:$0xff] %v704_v14 }
 0x16f   :  { %v910_v10 = vadd.f32 %v894_v53, %v782_v51  ;;  %v1607_v13 = vpop.eup %1606  ;;  %v768_v15 = vmul.f32 1.442695, %v738_v11  ;;  %v880_v16 = vmul.f32 1.442695, %v850_v12  ;;  %v928_v26 = vsel %vm2049_vm14, %v832_v20, 0.0 }
 0x170   :  { %v1609_v17 = vpop.eup %1608  ;;  %v780_v21 = vmul.f32 0.0, %v1607_v13  ;;  %v960_v54 = vmul.f32 %v928_v26, %v346_v48  ;;  %v764_v28 = vmul.f32 1.442695, %v736_v2  ;;  %v876_v29 = vmul.f32 1.442695, %v848_v25  ;;  %1024 = vst [vmem:[#allocation7 + $0x190] sm:$0xff] %v928_v26 }
 0x171   :  { %1006 = vst [vmem:[#allocation7 + $0x148] sm:$0xff] %v910_v10  ;;  %v892_v1 = vsel %vm1972_vm7, %v1609_v17, 0.0  ;;  %1618 = vpow2.f32 %v768_v15  ;;  %v691_v3 = vsel %vm2066_vm1, %v349_v46, -1e+30  ;;  %v931_v24 = vsel %vm2066_vm1, %v835_v55, 0.0 }
 0x172   :  { %v908_v47 = vadd.f32 %v892_v1, %v780_v21  ;;  %1620 = vpow2.f32 %v880_v16  ;;  %v707_v6 = vmax.f32 %v691_v3, -1e+30  ;;  %v963_v30 = vmul.f32 %v931_v24, %v349_v46  ;;  %1040 = vst [vmem:[#allocation7 + $0x198] sm:$0xff] %v960_v54  ;;  %1027 = vst [vmem:[#allocation7 + $0x1f0] sm:$0xff] %v931_v24 }
 0x173   :  { %v1611_v27 = vpop.eup %1610  ;;  %1622 = vpow2.f32 %v764_v28  ;;  %v347_v38 = vmul.f32 14.285714, %v1938_v9  ;;  %v833_v44 = vmax.f32 %v1950_v18, 0.0 }
 0x174   :  { %v1613_v39 = vpop.eup %1612  ;;  %1004 = vst [vmem:[#allocation7 + $0x108] sm:$0xff] %v908_v47  ;;  %v783_v60 = vmul.f32 0.0, %v1611_v27  ;;  %1624 = vpow2.f32 %v876_v29  ;;  %v739_v34 = vsub.f32 -1e+30, %v707_v6  ;;  %v851_v36 = vsub.f32 %v349_v46, %v707_v6  ;;  %995 = vst [vmem:[#allocation7 + $0x1e0] sm:$0xff] %v707_v6 }
 0x175   :  { %v895_v7 = vsel %vm1991_vm9, %v1613_v39, 0.0  ;;  %1043 = vst [vmem:[#allocation7 + $0x1f8] sm:$0xff] %v963_v30  ;;  %v689_v35 = vsel %vm2086_vm2, %v347_v38, -1e+30  ;;  %v929_v52 = vsel %vm2086_vm2, %v833_v44, 0.0 }
 0x176   :  { %v911_v31 = vadd.f32 %v895_v7, %v783_v60  ;;  %v1615_v50 = vpop.eup %1614  ;;  %v770_v19 = vmul.f32 1.442695, %v739_v34  ;;  %v882_v33 = vmul.f32 1.442695, %v851_v36  ;;  %v705_v9 = vmax.f32 %v689_v35, -1e+30 }
 0x177   :  { %v1617_v32 = vpop.eup %1616  ;;  %v781_v40 = vmul.f32 0.0, %v1615_v50  ;;  %v961_v18 = vmul.f32 %v929_v52, %v347_v38  ;;  %1025 = vst [vmem:[#allocation7 + $0x1b0] sm:$0xff] %v929_v52 }
 0x178   :  { %1007 = vst [vmem:[#allocation7 + $0x168] sm:$0xff] %v911_v31  ;;  %v893_v59 = vsel %vm2008_vm11, %v1617_v32, 0.0  ;;  %1626 = vpow2.f32 %v770_v19  ;;  %v737_v48 = vsub.f32 -1e+30, %v705_v9  ;;  %v849_v37 = vsub.f32 %v347_v38, %v705_v9  ;;  %993 = vst [vmem:[#allocation7 + $0x1a0] sm:$0xff] %v705_v9 }
 0x179   :  { %v909_v57 = vadd.f32 %v893_v59, %v781_v40  ;;  %1628 = vpow2.f32 %v882_v33  ;;  %1041 = vst [vmem:[#allocation7 + $0x1b8] sm:$0xff] %v961_v18 }
 0x17a   :  { %v766_v43 = vmul.f32 1.442695, %v737_v48  ;;  %v878_v62 = vmul.f32 1.442695, %v849_v37 }
 0x17b   :  { %v1619_v61 = vpop.eup %1618  ;;  %1005 = vst [vmem:[#allocation7 + $0x128] sm:$0xff] %v909_v57 }
 0x17c   :  { %v1621_v42 = vpop.eup %1620  ;;  %v786_v45 = vmul.f32 0.0, %v1619_v61  ;;  %1630 = vpow2.f32 %v766_v43 }
 0x17d   :  { %v898_v23 = vsel %vm2030_vm13, %v1621_v42, 0.0  ;;  %v1623_v41 = vpop.eup %1622  ;;  %1632 = vpow2.f32 %v878_v62 }
 0x17e   :  { %v914_v63 = vadd.f32 %v898_v23, %v786_v45  ;;  %v1625_v0 = vpop.eup %1624  ;;  %v784_v51 = vmul.f32 0.0, %v1623_v41 }
 0x17f   :  { %v896_v4 = vsel %vm2049_vm14, %v1625_v0, 0.0 }
 0x180   :  { %1010 = vst [vmem:[#allocation7 + $0x1c8] sm:$0xff] %v914_v63  ;;  %v912_v5 = vadd.f32 %v896_v4, %v784_v51 }
 0x182   :  { %v1627_v53 = vpop.eup %1626  ;;  %1008 = vst [vmem:[#allocation7 + $0x188] sm:$0xff] %v912_v5 }
 0x183   :  { %v1629_v8 = vpop.eup %1628  ;;  %v787_v10 = vmul.f32 0.0, %v1627_v53 }
 0x184   :  { %v899_v56 = vsel %vm2066_vm1, %v1629_v8, 0.0 }
 0x185   :  { %v915_v11 = vadd.f32 %v899_v56, %v787_v10 }
 0x186   :  { %v1631_v12 = vpop.eup %1630 }
 0x187   :  { %1011 = vst [vmem:[#allocation7 + $0x1e8] sm:$0xff] %v915_v11  ;;  %v1633_v13 = vpop.eup %1632  ;;  %v785_v14 = vmul.f32 0.0, %v1631_v12 }
 0x188   :  { %v897_v58 = vsel %vm2086_vm2, %v1633_v13, 0.0 }
 0x189   :  { %v913_v20 = vadd.f32 %v897_v58, %v785_v14 }
 0x18b   :  { %1009 = vst [vmem:[#allocation7 + $0x1a8] sm:$0xff] %v913_v20 }
 0x18c   :  { %1689 = shalt.err (!%p1686_p6)
}
 0x18d   :  { %s1690_s10 = scalar_lea.hbm %s2120_s2, 8192 }
 0x18e   :  { %p1691_p7 = scmp.ne.s32.totalorder %s2120_s2, %s1690_s10  ;;  %p1694_p8 = scmp.lt.u32.totalorder %s1690_s10, %s2120_s2 }
 0x190   :  { %p1696_p9 = pnand %p1694_p8, %p1691_p7 }
 0x192   :  { %1699 = shalt.err (!%p1696_p9)
}
 0x193   :  { %s1711_s15 = smov 512   ;;  %s1712_s16 = smov 32  }
 0x194   :  { %1394 = dma.vmem_to_hbm [thread:$0]  %s1389_s6, 8192, %s2120_s2, [#allocation4], %s1711_s15, %s1711_s15, %s1712_s16  }
 0x195   :  { %1704 = dma.done.wait [#allocation4], 8192  }
 0x196   :  { %1705 = vsyncadd [#allocation4], 4294959104 }
 0x197   :  { %1398 = vsyncpa [#allocation3], 1 }
 0x198   :  { %1399 = vsyncpa [#allocation6], 1 }
 0x199   :  { %1400 = vsyncpa [#allocation4], 1 }

</bundles_post_ra>
